<compile_context>
chip_gen: v7x
topology: tpu7x:2x2x1
jax: 0.10.0
libtpu: 0.0.40
codegen_flags: <defaults>
</compile_context>

<pallas_src>
import jax
import jax.numpy as jnp
from jax.experimental import pallas as pl
from jax.experimental.pallas import tpu as pltpu


def _postprocess_kernel(obj_logits_ref,   # VMEM (R, C)
                        verb_logits_ref,  # VMEM (R, V)
                        sub_boxes_ref,    # VMEM (R, 4)  (cx, cy, w, h)
                        obj_boxes_ref,    # VMEM (R, 4)  (cx, cy, w, h)
                        scale_ref,        # VMEM (R, 4)  per-row (w, h, w, h)
                        labels_ref,       # VMEM (1, R) i32   (lane-dense)
                        verb_out_ref,     # VMEM (R, V) f32
                        boxes_out_ref):   # VMEM (R, 8) f32   [sub_xyxy | obj_xyxy]
    logits = obj_logits_ref[...].astype(jnp.float32)              # (R, C)
    n_fg = logits.shape[-1] - 1                                   # drop "no-object"

    # --- softmax max / argmax over foreground classes, no (R, C) divide ---
    m = jnp.max(logits, axis=-1, keepdims=True)
    e = jnp.exp(logits - m)                                       # (R, C)
    inv_denom = pl.reciprocal(jnp.sum(e, axis=-1, keepdims=True), approx=False)
    p_fg = e[:, :n_fg] * inv_denom                                # (R, C-1)

    scores_col = jnp.max(p_fg, axis=-1, keepdims=True)            # (R, 1)

    iota = jax.lax.broadcasted_iota(jnp.int32, p_fg.shape, 1)
    # first-occurrence argmax (matches torch.max tie-breaking)
    labels_row = jnp.min(jnp.where(p_fg >= scores_col, iota, n_fg),
                         axis=-1).astype(jnp.int32)               # (R,)
    labels_ref[...] = labels_row[None, :]                         # (1, R) lane-dense

    # --- verb scores: sigmoid(verb_logits) * obj_score ---
    verb = verb_logits_ref[...].astype(jnp.float32)               # (R, V)
    verb_out_ref[...] = jax.nn.sigmoid(verb) * scores_col

    # --- boxes: cxcywh -> xyxy, scaled by per-row (w, h, w, h) ---
    sc = scale_ref[...].astype(jnp.float32)                       # (R, 4)

    def cxcywh_to_xyxy_scaled(box):
        box = box.astype(jnp.float32)                             # (R, 4)
        c = box[:, 0:2]
        half = 0.5 * box[:, 2:4]
        return jnp.concatenate([c - half, c + half], axis=-1) * sc

    boxes_out_ref[...] = jnp.concatenate(
        [cxcywh_to_xyxy_scaled(sub_boxes_ref[...]),
         cxcywh_to_xyxy_scaled(obj_boxes_ref[...])], axis=-1)     # (R, 8)


def post_process_hoi_pallas(outputs, target_sizes, subject_category_id):
    obj_logits = outputs['pred_obj_logits']
    verb_logits = outputs['pred_verb_logits']
    sub_boxes = outputs['pred_sub_boxes']
    obj_boxes = outputs['pred_obj_boxes']

    B, Q, C = obj_logits.shape
    V = verb_logits.shape[-1]
    assert target_sizes.shape == (B, 2)
    R = B * Q

    # Precompute per-row scale (w, h, w, h) so the kernel reads no scalars.
    ts = target_sizes.astype(jnp.float32)
    img_h, img_w = ts[:, 0], ts[:, 1]
    scale_b4 = jnp.stack([img_w, img_h, img_w, img_h], axis=1)              # (B, 4)
    scale_r4 = jnp.broadcast_to(scale_b4[:, None, :], (B, Q, 4)).reshape(R, 4)

    vmem = pltpu.MemorySpace.VMEM
    out_shapes = (
        jax.ShapeDtypeStruct((1, R), jnp.int32),     # obj labels  (lane-dense)
        jax.ShapeDtypeStruct((R, V), jnp.float32),   # verb scores (already * obj score)
        jax.ShapeDtypeStruct((R, 8), jnp.float32),   # [sub_xyxy | obj_xyxy], scaled
    )

    labels, verb_scores, boxes8 = pl.pallas_call(
        _postprocess_kernel,
        out_shape=out_shapes,
        in_specs=[pl.BlockSpec(memory_space=vmem)] * 5,
        out_specs=tuple(pl.BlockSpec(memory_space=vmem) for _ in range(3)),
    )(obj_logits.reshape(R, C), verb_logits.reshape(R, V),
      sub_boxes.reshape(R, 4), obj_boxes.reshape(R, 4), scale_r4)

    # --- batched glue (single concat each, per-image dicts just index) ---
    obj_labels = labels.reshape(B, Q)
    verb_scores = verb_scores.reshape(B, Q, V)
    boxes = boxes8.reshape(B, Q, 8)

    sub_lbl = jnp.full((B, Q), subject_category_id, dtype=jnp.int32)
    all_labels = jnp.concatenate([sub_lbl, obj_labels], axis=1)             # (B, 2Q)
    all_boxes = jnp.concatenate([boxes[..., :4], boxes[..., 4:]], axis=1)   # (B, 2Q, 4)

    ids = jnp.arange(2 * Q, dtype=jnp.int32)
    # (The torch module's .to('cpu') host transfer has no Pallas equivalent;
    #  results stay as device arrays here.)
    results = [{
        'labels': all_labels[b],
        'boxes': all_boxes[b],
        'verb_scores': verb_scores[b],
        'sub_ids': ids[:Q],
        'obj_ids': ids[Q:],
    } for b in range(B)]
    return results


def _reference(outputs, target_sizes):
    """Pure-JAX reference mirroring the torch forward (for verification)."""
    prob = jax.nn.softmax(outputs['pred_obj_logits'], -1)
    scores = prob[..., :-1].max(-1)
    labels = prob[..., :-1].argmax(-1).astype(jnp.int32)
    verb = jax.nn.sigmoid(outputs['pred_verb_logits']) * scores[..., None]
    h = target_sizes[:, 0]
    w = target_sizes[:, 1]
    scale = jnp.stack([w, h, w, h], axis=1)[:, None, :]

    def cvt(box):
        cx, cy, ww, hh = jnp.split(box, 4, axis=-1)
        return jnp.concatenate(
            [cx - 0.5 * ww, cy - 0.5 * hh, cx + 0.5 * ww, cy + 0.5 * hh], axis=-1)

    sub = cvt(outputs['pred_sub_boxes']) * scale
    obj = cvt(outputs['pred_obj_boxes']) * scale
    return scores, labels, verb, sub, obj


if __name__ == "__main__":
    key = jax.random.PRNGKey(0)
    B, Q, C, V = 2, 8, 12, 6          # C includes the trailing "no-object" class
    SUBJECT_CATEGORY_ID = 0           # module's only "parameter" (deterministic)

    k1, k2, k3, k4 = jax.random.split(key, 4)
    outputs = {
        'pred_obj_logits': jax.random.normal(k1, (B, Q, C), jnp.float32),
        'pred_verb_logits': jax.random.normal(k2, (B, Q, V), jnp.float32),
        'pred_sub_boxes': jax.nn.sigmoid(jax.random.normal(k3, (B, Q, 4), jnp.float32)),
        'pred_obj_boxes': jax.nn.sigmoid(jax.random.normal(k4, (B, Q, 4), jnp.float32)),
    }
    target_sizes = jnp.array([[480.0, 640.0], [512.0, 768.0]], jnp.float32)  # (h, w)

    results = post_process_hoi_pallas(outputs, target_sizes, SUBJECT_CATEGORY_ID)
    for r in results:
        for v in r.values():
            jax.block_until_ready(v)

    # verify against pure-JAX reference
    ref_scores, ref_labels, ref_verb, ref_sub, ref_obj = _reference(outputs, target_sizes)
    for b, r in enumerate(results):
        assert jnp.allclose(r['verb_scores'], ref_verb[b], atol=1e-5), "verb_scores mismatch"
        assert jnp.allclose(r['boxes'][:Q], ref_sub[b], atol=1e-4), "sub boxes mismatch"
        assert jnp.allclose(r['boxes'][Q:], ref_obj[b], atol=1e-4), "obj boxes mismatch"
        assert jnp.array_equal(r['labels'][:Q],
                               jnp.full((Q,), SUBJECT_CATEGORY_ID, jnp.int32)), "subject labels"
        assert jnp.array_equal(r['labels'][Q:], ref_labels[b]), "obj labels mismatch"
        assert jnp.array_equal(r['sub_ids'], jnp.arange(Q, dtype=jnp.int32))
        assert jnp.array_equal(r['obj_ids'], jnp.arange(Q, 2 * Q, dtype=jnp.int32))

    print("KERNEL_OK")
</pallas_src>

<mosaic_0001>
module attributes {stable_mosaic.version = 11 : i64} {
  func.func @_postprocess_kernel(%arg0: memref<16x12xf32, #tpu.memory_space<vmem>>, %arg1: memref<16x6xf32, #tpu.memory_space<vmem>>, %arg2: memref<16x4xf32, #tpu.memory_space<vmem>>, %arg3: memref<16x4xf32, #tpu.memory_space<vmem>>, %arg4: memref<16x4xf32, #tpu.memory_space<vmem>>, %arg5: memref<1x16xi32, #tpu.memory_space<vmem>>, %arg6: memref<16x6xf32, #tpu.memory_space<vmem>>, %arg7: memref<16x8xf32, #tpu.memory_space<vmem>>) attributes {dimension_semantics = [], scalar_prefetch = 0 : i64, scratch_operands = 0 : i64, tpu.core_type = #tpu.core_type<tc>} {
    %c0 = arith.constant 0 : index
    %c0_0 = arith.constant 0 : index
    %0 = vector.load %arg0[%c0, %c0_0] : memref<16x12xf32, #tpu.memory_space<vmem>>, vector<16x12xf32>
    %cst = arith.constant dense<0xFF800000> : vector<16xf32>
    %1 = vector.multi_reduction <maximumf>, %0, %cst [1] : vector<16x12xf32> to vector<16xf32>
    %2 = vector.shape_cast %1 : vector<16xf32> to vector<16x1xf32>
    %3 = vector.broadcast %2 : vector<16x1xf32> to vector<16x12xf32>
    %4 = arith.subf %0, %3 : vector<16x12xf32>
    %5 = math.exp %4 : vector<16x12xf32>
    %cst_1 = arith.constant dense<0.000000e+00> : vector<16xf32>
    %6 = vector.multi_reduction <add>, %5, %cst_1 [1] : vector<16x12xf32> to vector<16xf32>
    %7 = vector.shape_cast %6 : vector<16xf32> to vector<16x1xf32>
    %8 = tpu.reciprocal %7 : vector<16x1xf32> -> vector<16x1xf32>
    %9 = vector.extract_strided_slice %5 {offsets = [0, 0], sizes = [16, 11], strides = [1, 1]} : vector<16x12xf32> to vector<16x11xf32>
    %10 = vector.broadcast %8 : vector<16x1xf32> to vector<16x11xf32>
    %11 = arith.mulf %9, %10 : vector<16x11xf32>
    %cst_2 = arith.constant dense<0xFF800000> : vector<16xf32>
    %12 = vector.multi_reduction <maximumf>, %11, %cst_2 [1] : vector<16x11xf32> to vector<16xf32>
    %13 = vector.shape_cast %12 : vector<16xf32> to vector<16x1xf32>
    %14 = tpu.iota {dimensions = array<i32: 1>} : vector<16x11xi32>
    %15 = vector.broadcast %13 : vector<16x1xf32> to vector<16x11xf32>
    %16 = arith.cmpf oge, %11, %15 : vector<16x11xf32>
    %c11_i32 = arith.constant 11 : i32
    %17 = vector.broadcast %c11_i32 : i32 to vector<16x11xi32>
    %18 = arith.select %16, %14, %17 : vector<16x11xi1>, vector<16x11xi32>
    %cst_3 = arith.constant dense<2147483647> : vector<16xi32>
    %19 = vector.multi_reduction <minsi>, %18, %cst_3 [1] : vector<16x11xi32> to vector<16xi32>
    %20 = vector.shape_cast %19 : vector<16xi32> to vector<1x16xi32>
    %c0_4 = arith.constant 0 : index
    %c0_5 = arith.constant 0 : index
    %21 = vector.load %arg5[%c0_4, %c0_5] : memref<1x16xi32, #tpu.memory_space<vmem>>, vector<1x16xi32>
    tpu.vector_store %arg5[%c0_4, %c0_5], %20 {strides = array<i32>} : memref<1x16xi32, #tpu.memory_space<vmem>>, vector<1x16xi32>,
    %c0_6 = arith.constant 0 : index
    %c0_7 = arith.constant 0 : index
    %22 = vector.load %arg1[%c0_6, %c0_7] : memref<16x6xf32, #tpu.memory_space<vmem>>, vector<16x6xf32>
    %23 = arith.negf %22 : vector<16x6xf32>
    %24 = math.exp %23 : vector<16x6xf32>
    %cst_8 = arith.constant 1.000000e+00 : f32
    %25 = vector.broadcast %cst_8 : f32 to vector<16x6xf32>
    %26 = arith.addf %25, %24 : vector<16x6xf32>
    %27 = arith.divf %25, %26 : vector<16x6xf32>
    %28 = vector.broadcast %13 : vector<16x1xf32> to vector<16x6xf32>
    %29 = arith.mulf %27, %28 : vector<16x6xf32>
    %c0_9 = arith.constant 0 : index
    %c0_10 = arith.constant 0 : index
    %30 = vector.load %arg6[%c0_9, %c0_10] : memref<16x6xf32, #tpu.memory_space<vmem>>, vector<16x6xf32>
    tpu.vector_store %arg6[%c0_9, %c0_10], %29 {strides = array<i32>} : memref<16x6xf32, #tpu.memory_space<vmem>>, vector<16x6xf32>,
    %c0_11 = arith.constant 0 : index
    %c0_12 = arith.constant 0 : index
    %31 = vector.load %arg4[%c0_11, %c0_12] : memref<16x4xf32, #tpu.memory_space<vmem>>, vector<16x4xf32>
    %c0_13 = arith.constant 0 : index
    %c0_14 = arith.constant 0 : index
    %32 = vector.load %arg2[%c0_13, %c0_14] : memref<16x4xf32, #tpu.memory_space<vmem>>, vector<16x4xf32>
    %33 = vector.extract_strided_slice %32 {offsets = [0, 0], sizes = [16, 2], strides = [1, 1]} : vector<16x4xf32> to vector<16x2xf32>
    %34 = vector.extract_strided_slice %32 {offsets = [0, 2], sizes = [16, 2], strides = [1, 1]} : vector<16x4xf32> to vector<16x2xf32>
    %cst_15 = arith.constant 5.000000e-01 : f32
    %35 = vector.broadcast %cst_15 : f32 to vector<16x2xf32>
    %36 = arith.mulf %35, %34 : vector<16x2xf32>
    %37 = arith.subf %33, %36 : vector<16x2xf32>
    %38 = arith.addf %33, %36 : vector<16x2xf32>
    %39 = tpu.concatenate %37, %38 in 1 : vector<16x2xf32>, vector<16x2xf32> -> vector<16x4xf32>
    %40 = arith.mulf %39, %31 : vector<16x4xf32>
    %c0_16 = arith.constant 0 : index
    %c0_17 = arith.constant 0 : index
    %41 = vector.load %arg3[%c0_16, %c0_17] : memref<16x4xf32, #tpu.memory_space<vmem>>, vector<16x4xf32>
    %42 = vector.extract_strided_slice %41 {offsets = [0, 0], sizes = [16, 2], strides = [1, 1]} : vector<16x4xf32> to vector<16x2xf32>
    %43 = vector.extract_strided_slice %41 {offsets = [0, 2], sizes = [16, 2], strides = [1, 1]} : vector<16x4xf32> to vector<16x2xf32>
    %cst_18 = arith.constant 5.000000e-01 : f32
    %44 = vector.broadcast %cst_18 : f32 to vector<16x2xf32>
    %45 = arith.mulf %44, %43 : vector<16x2xf32>
    %46 = arith.subf %42, %45 : vector<16x2xf32>
    %47 = arith.addf %42, %45 : vector<16x2xf32>
    %48 = tpu.concatenate %46, %47 in 1 : vector<16x2xf32>, vector<16x2xf32> -> vector<16x4xf32>
    %49 = arith.mulf %48, %31 : vector<16x4xf32>
    %50 = tpu.concatenate %40, %49 in 1 : vector<16x4xf32>, vector<16x4xf32> -> vector<16x8xf32>
    %c0_19 = arith.constant 0 : index
    %c0_20 = arith.constant 0 : index
    %51 = vector.load %arg7[%c0_19, %c0_20] : memref<16x8xf32, #tpu.memory_space<vmem>>, vector<16x8xf32>
    tpu.vector_store %arg7[%c0_19, %c0_20], %50 {strides = array<i32>} : memref<16x8xf32, #tpu.memory_space<vmem>>, vector<16x8xf32>,
    return
  }
}

</mosaic_0001>

<bundles_post_ra>
// kernel: tpu_custom_call.1
= control target key start
LH: loop header
LB: loop body
LE: loop exit
PB: predicated region body
PF: predicated region fallthrough
CT: control target
= control target key end

     0   :  { %vm26_vm0 = vcmask 97280   ;;  %s397_s0 = inlined_call_operand.vmem [shape: f32[16,12], index: 0, kind: input, shape index: {}]   ;;  %s398_s1 = inlined_call_operand.vmem [shape: f32[16,6], index: 1, kind: input, shape index: {}]   ;;  %s399_s2 = inlined_call_operand.vmem [shape: f32[16,4], index: 2, kind: input, shape index: {}]   ;;  %s400_s3 = inlined_call_operand.vmem [shape: f32[16,4], index: 3, kind: input, shape index: {}]   ;;  %s401_s4 = inlined_call_operand.vmem [shape: f32[16,4], index: 4, kind: input, shape index: {}]   ;;  %s402_s5 = inlined_call_operand.hbm [shape: s32[1,16], index: 5, kind: output, shape index: {0}]   ;;  %s403_s6 = inlined_call_operand.vmem [shape: f32[16,6], index: 6, kind: output, shape index: {1}]   ;;  %s404_s7 = inlined_call_operand.vmem [shape: f32[16,8], index: 7, kind: output, shape index: {2}]  }
   0x1   :  { %v24_v0 = vld [vmem:[%s397_s0] sm:$0xff]  ;;  %v25_v1 = vld [vmem:[%s397_s0 + $0x8] sm:$0xff] }
   0x2   :  { %13 = vsyncpa [#allocation3], 0  ;;  %v27_v2 = vsel %vm26_vm0, %v24_v0, -inf  ;;  %v30_v3 = vsel %vm26_vm0, %v25_v1, -inf  ;;  %vm49_vm1 = vcmask 89088   ;;  %v324_v22 = vld [vmem:[%s400_s3 + $0x8] sm:$0xff]  ;;  %v56_v34 = vlaneseq }
   0x3   :  { %28 = vmax.xlane.f32.xlu0 %v27_v2  ;;  %v329_v23 = vld [vmem:[%s400_s3] sm:$0xff]  ;;  %v158_v24 = vmul.f32 0.5, %v324_v22  ;;  %s265_s8 = smov 126   ;;  %v106_v28 = vld [vmem:[%s398_s1 + $0x8] sm:$0xff]  ;;  %vm121_vm2 = vcmask 48128   ;;  %vm150_vm7 = vcmask 15360  }
   0x4   :  { %v157_v25 = vmul.f32 0.5, %v329_v23  ;;  %v105_v26 = vld [vmem:[%s398_s1] sm:$0xff]  ;;  %v220_v29 = vmul.f32 -1.442695, %v106_v28  ;;  %v342_v36 = vand.u32 127, %v56_v34  ;;  %v127_v50 = vld [vmem:[%s399_s2 + $0x8] sm:$0xff] }
   0x5   :  { %v219_v27 = vmul.f32 -1.442695, %v105_v26  ;;  %v129_v51 = vmul.f32 0.5, %v127_v50  ;;  %v126_v55 = vld [vmem:[%s399_s2] sm:$0xff]  ;;  %s267_s22 = smov 4   ;;  %vm191_vm8 = vcmask 31744  }
   0x6   :  { %v128_v57 = vmul.f32 0.5, %v126_v55  ;;  %vm194_vm9 = vcmask 64512   ;;  %vm101_vm10 = vcmask 130112   ;;  %vm103_vm11 = vcmask 122880  }
   0x7   :  { %31 = vmax.xlane.f32.xlu0 %v30_v3 }
  0x90   :  { %v29_v4 = vpop.xlane.xlu0 %28 }
  0x91   :  { %v33_v5 = vsub.f32 %v24_v0, %v29_v4 }
  0x93   :  { %v35_v6 = vmul.f32 1.442695, %v33_v5 }
  0x94   :  { %v32_v7 = vpop.xlane.xlu0 %31 }
  0x95   :  { %225 = vpow2.f32 %v35_v6  ;;  %v34_v8 = vsub.f32 %v25_v1, %v32_v7 }
  0x97   :  { %v37_v9 = vmul.f32 1.442695, %v34_v8 }
  0x99   :  { %227 = vpow2.f32 %v37_v9  ;;  %v125_v9 = vld [vmem:[%s401_s4 + $0x8] sm:$0xff] }
  0x9f   :  { %v226_v10 = vpop.eup %225 }
  0xa0   :  { %v39_v11 = vsel %vm26_vm0, %v226_v10, 0.0 }
  0xa1   :  { %40 = vadd.xlane.f32.xlu1 %v39_v11 }
  0xa3   :  { %v228_v12 = vpop.eup %227 }
  0xa4   :  { %v42_v13 = vsel %vm26_vm0, %v228_v12, 0.0 }
  0xa5   :  { %43 = vadd.xlane.f32.xlu1 %v42_v13  ;;  %v124_v13 = vld [vmem:[%s401_s4] sm:$0xff]  ;;  %s268_s4 = smov [#allocation2]  }
  0xa6   :  { %s203_s23 = sshll.u32 %s268_s4, 4  ;;  %s204_s23 = int_to_ptr.vmem [resolvable:$true] %s203_s23 }
  0xa7   :  { %s241_s0 = scalar_lea.vmem %s204_s23, 16  ;;  %s245_s28 = scalar_lea.vmem %s204_s23, 32 }
  0xa8   :  { %p242_p0 = scmp.ne.s32.totalorder %s204_s23, %s241_s0  ;;  %p246_p1 = scmp.lt.s32.totalorder %s204_s23, %s204_s23 }
  0xa9   :  { %p247_p2 = scmp.lt.s32.totalorder %s245_s28, %s241_s0 }
  0xab   :  { %p248_p3 = por %p247_p2, %p246_p1 }
  0xad   :  { %p249_p4 = pnand %p248_p3, %p242_p0 }
 0x12e   :  { %v41_v14 = vpop.xlane.xlu1 %40 }
 0x12f   :  { %229 = vrcp.f32 %v41_v14 }
 0x132   :  { %v44_v15 = vpop.xlane.xlu1 %43 }
 0x133   :  { %231 = vrcp.f32 %v44_v15 }
 0x134   :  { %233 = vpow2.f32 %v219_v27 }
 0x135   :  { %235 = vpow2.f32 %v220_v29 }
 0x139   :  { %v230_v16 = vpop.eup %229 }
 0x13a   :  { %v47_v17 = vmul.f32 %v230_v16, %v226_v10 }
 0x13c   :  { %v50_v18 = vsel %vm49_vm1, %v47_v17, -inf }
 0x13d   :  { %v232_v19 = vpop.eup %231  ;;  %51 = vmax.xlane.f32.xlu0 %v50_v18 }
 0x13e   :  { %v48_v20 = vmul.f32 %v232_v19, %v228_v12  ;;  %v234_v30 = vpop.eup %233  ;;  %v93_v19 = vshrl.u32 %v56_v34, 7 }
 0x13f   :  { %v113_v31 = vadd.f32 1.0, %v234_v30  ;;  %v236_v32 = vpop.eup %235 }
 0x140   :  { %v53_v21 = vsel %vm49_vm1, %v48_v20, -inf  ;;  %v114_v33 = vadd.f32 1.0, %v236_v32  ;;  %v94_v28 = vsub.s32 %v342_v36, %v93_v19 }
 0x141   :  { %54 = vmax.xlane.f32.xlu1 %v53_v21  ;;  %237 = vrcp.f32 %v113_v31 }
 0x142   :  { %239 = vrcp.f32 %v114_v33 }
 0x14b   :  { %v238_v35 = vpop.eup %237 }
 0x14c   :  { %v240_v39 = vpop.eup %239 }
 0x152   :  { %163 = vrot.lane.b32.xlu1 %v158_v24, %s265_s8 }
 0x153   :  { %161 = vrot.lane.b32.xlu0 %v157_v25, %s265_s8 }
 0x1ca   :  { %v52_v37 = vpop.xlane.xlu0 %51 }
 0x1cb   :  { %vm58_vm3 = vcmp.ge.f32.partialorder %v47_v17, %v52_v37  ;;  %v119_v38 = vmul.f32 %v238_v35, %v52_v37 }
 0x1cc   :  { %v60_v40 = vsel %vm58_vm3, %v342_v36, 11 }
 0x1cd   :  { %122 = vst.msk [vmem:[%s403_s6] sm:$0xff] %vm121_vm2, %v119_v38  ;;  %v62_v41 = vsel %vm49_vm1, %v60_v40, 2147483647 }
 0x1ce   :  { %v55_v42 = vpop.xlane.xlu1 %54  ;;  %v64_v43 = vshra.s32 %v62_v41, 16  ;;  %v162_v52 = vpop.permute.xlu0 %161  ;;  %v63_v0 = vand.u32 65535, %v62_v41 }
 0x1cf   :  { %vm59_vm4 = vcmp.ge.f32.partialorder %v48_v20, %v55_v42  ;;  %v120_v44 = vmul.f32 %v240_v39, %v55_v42  ;;  %v169_v53 = vadd.f32 %v162_v52, %v329_v23  ;;  %v167_v11 = vsub.f32 %v329_v23, %v162_v52 }
 0x1d0   :  { %v61_v45 = vsel %vm59_vm4, %v342_v36, 11  ;;  %v66_v46 = vcvt.s32.f32 %v64_v43  ;;  %v65_v2 = vcvt.s32.f32 %v63_v0 }
 0x1d1   :  { %123 = vst.msk [vmem:[%s403_s6 + $0x8] sm:$0xff] %vm121_vm2, %v120_v44  ;;  %v77_v47 = vsel %vm49_vm1, %v61_v45, 2147483647  ;;  %s266_s6 = smov 2  }
 0x1d2   :  { %67 = vmin.xlane.f32.xlu1 %v66_v46  ;;  %v79_v48 = vshra.s32 %v77_v47, 16  ;;  %v164_v54 = vpop.permute.xlu1 %163  ;;  %v78_v1 = vand.u32 65535, %v77_v47 }
 0x1d3   :  { %v170_v56 = vadd.f32 %v164_v54, %v324_v22  ;;  %v168_v8 = vsub.f32 %v324_v22, %v164_v54  ;;  %v96_v22 = vadd.s32 4294967288, %v342_v36 }
 0x1d4   :  { %v81_v49 = vcvt.s32.f32 %v79_v48  ;;  %v80_v3 = vcvt.s32.f32 %v78_v1 }
 0x1d5   :  { %v99_v32 = vsub.s32 %v96_v22, %v93_v19 }
 0x1d6   :  { %82 = vmin.xlane.f32.xlu0 %v81_v49 }
 0x1e3   :  { %134 = vrot.lane.b32.xlu1 %v129_v51, %s265_s8 }
 0x1e7   :  { %173 = vrot.lane.b32.xlu1 %v169_v53, %s266_s6 }
 0x1eb   :  { %175 = vrot.lane.b32.xlu1 %v170_v56, %s266_s6 }
 0x1ec   :  { %132 = vrot.lane.b32.xlu0 %v128_v57, %s265_s8 }
 0x25f   :  { %v68_v58 = vpop.xlane.xlu1 %67 }
 0x260   :  { %vm69_vm5 = vcmp.eq.f32.partialorder %v66_v46, %v68_v58  ;;  %v74_v17 = vcvt.f32.s32 %v68_v58 }
 0x261   :  { %v70_v4 = vsel %vm69_vm5, %v65_v2, inf }
 0x262   :  { %v75_v26 = vshll.u32 %v74_v17, 16 }
 0x263   :  { %v135_v59 = vpop.permute.xlu1 %134  ;;  %v83_v60 = vpop.xlane.xlu0 %82 }
 0x264   :  { %v141_v61 = vadd.f32 %v135_v59, %v127_v50  ;;  %vm84_vm6 = vcmp.eq.f32.partialorder %v81_v49, %v83_v60  ;;  %v89_v20 = vcvt.f32.s32 %v83_v60  ;;  %v139_v23 = vsub.f32 %v127_v50, %v135_v59 }
 0x265   :  { %v85_v5 = vsel %vm84_vm6, %v80_v3, inf }
 0x266   :  { %146 = vrot.lane.b32.xlu1 %v141_v61, %s266_s6  ;;  %v90_v31 = vshll.u32 %v89_v20, 16 }
 0x267   :  { %v133_v62 = vpop.permute.xlu0 %132  ;;  %v174_v6 = vpop.permute.xlu1 %173 }
 0x268   :  { %v140_v63 = vadd.f32 %v133_v62, %v126_v55  ;;  %v179_v14 = vsel %vm150_vm7, %v167_v11, %v174_v6  ;;  %v138_v21 = vsub.f32 %v126_v55, %v133_v62 }
 0x269   :  { %v181_v15 = vmul.f32 %v179_v14, %v124_v13 }
 0x26a   :  { %144 = vrot.lane.b32.xlu0 %v140_v63, %s266_s6 }
 0x26b   :  { %v176_v7 = vpop.permute.xlu1 %175 }
 0x26c   :  { %v180_v10 = vsel %vm150_vm7, %v168_v8, %v176_v7 }
 0x26d   :  { %v182_v12 = vmul.f32 %v180_v10, %v125_v9 }
 0x289   :  { %71 = vmin.xlane.f32.xlu0 %v70_v4 }
 0x28a   :  { %86 = vmin.xlane.f32.xlu1 %v85_v5 }
 0x29b   :  { %187 = vrot.lane.b32.xlu1 %v182_v12, %s267_s22 }
 0x29f   :  { %185 = vrot.lane.b32.xlu0 %v181_v15, %s267_s22 }
 0x2d8   :  { %v147_v18 = vpop.permute.xlu1 %146 }
 0x2d9   :  { %v152_v27 = vsel %vm150_vm7, %v139_v23, %v147_v18 }
 0x2da   :  { %v154_v37 = vmul.f32 %v152_v27, %v125_v9 }
 0x2dc   :  { %v145_v16 = vpop.permute.xlu0 %144 }
 0x2dd   :  { %v151_v24 = vsel %vm150_vm7, %v138_v21, %v145_v16 }
 0x2de   :  { %v153_v34 = vmul.f32 %v151_v24, %v124_v13 }
 0x316   :  { %v72_v25 = vpop.xlane.xlu0 %71 }
 0x317   :  { %v73_v29 = vcvt.f32.s32 %v72_v25  ;;  %v87_v30 = vpop.xlane.xlu1 %86 }
 0x318   :  { %v88_v33 = vcvt.f32.s32 %v87_v30 }
 0x319   :  { %v76_v35 = vadd.s32 %v75_v26, %v73_v29 }
 0x31a   :  { %v91_v38 = vadd.s32 %v90_v31, %v88_v33  ;;  %v186_v39 = vpop.permute.xlu0 %185 }
 0x31b   :  { %v95_v40 = vrot.slane %v76_v35, %v94_v28  ;;  %v192_v41 = vsel %vm191_vm8, %v153_v34, %v186_v39  ;;  %v188_v42 = vpop.permute.xlu1 %187 }
 0x31c   :  { %v100_v43 = vrot.slane %v91_v38, %v99_v32  ;;  %195 = vst.msk [vmem:[%s404_s7] sm:$0xff] %vm194_vm9, %v192_v41  ;;  %v193_v36 = vsel %vm191_vm8, %v154_v37, %v188_v42 }
 0x31d   :  { %196 = vst.msk [vmem:[%s404_s7 + $0x8] sm:$0xff] %vm194_vm9, %v193_v36 }
 0x31e   :  { %v102_v44 = vsel %vm101_vm10, %v100_v43, %v95_v40 }
 0x31f   :  { %104 = vst.msk [vmem:[#allocation2] sm:$0x1] %vm103_vm11, %v102_v44 }
 0x320   :  { %252 = shalt.err (!%p249_p4)
}
 0x321   :  { %s253_s8 = scalar_lea.hbm %s402_s5, 16 }
 0x322   :  { %p254_p5 = scmp.ne.s32.totalorder %s402_s5, %s253_s8  ;;  %p257_p6 = scmp.lt.u32.totalorder %s253_s8, %s402_s5 }
 0x324   :  { %p259_p7 = pnand %p257_p6, %p254_p5 }
 0x326   :  { %262 = shalt.err (!%p259_p7)
}
 0x327   :  { %206 = dma.vmem_to_hbm [thread:$0]  %s204_s23, 16, %s402_s5, [#allocation3]  }
 0x328   :  { %263 = dma.done.wait [#allocation3], 16  }
 0x329   :  { %264 = vsyncadd [#allocation3], 4294967280 }
 0x32a   :  { %218 = vsyncpa [#allocation3], 1 }

</bundles_post_ra>
